<compile_context>
chip_gen: v7x
topology: tpu7x:2x2x1
jax: 0.10.0
libtpu: 0.0.40
codegen_flags: <defaults>
</compile_context>

<pallas_src>
import functools

import jax
import jax.numpy as jnp
from jax import lax
from jax.experimental import pallas as pl
from jax.experimental.pallas import tpu as pltpu

BN_EPS = 1e-5  # PyTorch BatchNorm1d default


# ----------------------------------------------------------------------------
# Kernel: one fused  Linear(no bias) -> BatchNorm1d(train) [-> ReLU]  layer.
# Grid = (N // tn,)  [parallel].  Full-K contraction per N-tile in one dot.
# The full batch B lives on the sublane axis of every block, so the per-N-tile
# BN batch statistics are exact.
# ----------------------------------------------------------------------------
def _linear_bn_act_kernel(relu, affine, x_ref, w_ref, *rest):
    if affine:
        g_ref, b_ref, o_ref = rest
    else:
        (o_ref,) = rest

    # bf16 x bf16 -> f32 accumulate on the MXU, full K in one shot.
    h = jnp.dot(x_ref[...], w_ref[...], preferred_element_type=jnp.float32)

    # Train-mode BatchNorm1d: biased stats over the full batch, single pass.
    mu = jnp.mean(h, axis=0, keepdims=True)
    var = jnp.maximum(jnp.mean(h * h, axis=0, keepdims=True) - mu * mu, 0.0)
    inv = lax.rsqrt(var + BN_EPS)                      # EUP
    if affine:
        s = g_ref[...] * inv
        t = b_ref[...] - mu * s
    else:
        s = inv
        t = -(mu * s)
    z = h * s + t                                      # folded scale/shift
    if relu:
        z = jnp.maximum(z, 0.0)
    o_ref[...] = z.astype(o_ref.dtype)


def _pick_tn(N, block_n):
    """Lane-aligned N tile; prefer >= 2 grid steps so v7x's 2nd core has work."""
    for cand in (block_n, 256, 128):
        if N % cand == 0 and N // cand >= 2:
            return cand
    for cand in (block_n, 256, 128):
        if N % cand == 0:
            return cand
    return N  # fallback: full extent (masked stores; pad feature dims to avoid)


def _fused_linear_bn_act(x, w, gamma=None, beta=None, *, relu=False,
                         block_n=256, out_dtype=jnp.float32):
    """One projection_MLP layer: y = act(BN(x @ w)) with train-mode BN."""
    B, K = x.shape
    Kw, N = w.shape
    assert K == Kw, (K, Kw)

    # Operands for the MXU are bf16 (weights should already be pre-cast once
    # via prepare_projection_mlp_params; astype is then a no-op).
    x_bf = x.astype(jnp.bfloat16)
    w_bf = w.astype(jnp.bfloat16)

    tn = _pick_tn(N, block_n)
    grid = (N // tn,)

    in_specs = [
        pl.BlockSpec((B, K), lambda j: (0, 0)),    # activations: whole batch, full K, resident
        pl.BlockSpec((K, tn), lambda j: (0, j)),   # weights: full K, N-tile (streamed)
    ]
    args = [x_bf, w_bf]
    affine = gamma is not None
    if affine:
        in_specs.append(pl.BlockSpec((1, tn), lambda j: (0, j)))
        in_specs.append(pl.BlockSpec((1, tn), lambda j: (0, j)))
        args.append(gamma.astype(jnp.float32))
        args.append(beta.astype(jnp.float32))

    kernel = functools.partial(_linear_bn_act_kernel, relu, affine)

    out_itemsize = jnp.dtype(out_dtype).itemsize
    # Double-buffered x + w + out, plus small BN params; headroom factor 2.
    vmem_need = (2 * B * K * 2 + 2 * K * tn * 2 + 2 * B * tn * out_itemsize
                 + (4 * 2 * tn * 4 if affine else 0))
    vmem_limit = int(min(128 * 1024 * 1024, max(32 * 1024 * 1024, 2 * vmem_need)))

    cost = pl.CostEstimate(
        flops=2 * B * K * N + 8 * B * N,           # matmul + BN/ReLU elementwise
        transcendentals=N,                         # rsqrt per feature
        bytes_accessed=B * K * 2 + K * N * 2 + B * N * out_itemsize,
    )

    return pl.pallas_call(
        kernel,
        out_shape=jax.ShapeDtypeStruct((B, N), out_dtype),
        grid_spec=pltpu.PrefetchScalarGridSpec(
            num_scalar_prefetch=0,
            grid=grid,
            in_specs=in_specs,
            out_specs=pl.BlockSpec((B, tn), lambda j: (0, j)),
        ),
        compiler_params=pltpu.CompilerParams(
            dimension_semantics=("parallel",),
            vmem_limit_bytes=vmem_limit),
        cost_estimate=cost,
    )(*args)


# ----------------------------------------------------------------------------
# Module wrapper
# ----------------------------------------------------------------------------
def projection_mlp(x, params, num_layers=2):
    assert num_layers in (2, 3)
    # Linear biases are intentionally NOT passed: a per-feature constant added
    # before train-mode BatchNorm cancels exactly in (h - mean(h)).
    h = x.astype(jnp.bfloat16)
    h = _fused_linear_bn_act(h, params["w1"], params["g1"], params["be1"],
                             relu=True, out_dtype=jnp.bfloat16)
    if num_layers == 3:  # layer-2 tensors are only touched / DMA'd in this branch
        h = _fused_linear_bn_act(h, params["w2"], params["g2"], params["be2"],
                                 relu=True, out_dtype=jnp.bfloat16)
    # layer3: BN without affine, no ReLU; final output in f32.
    return _fused_linear_bn_act(h, params["w3"], relu=False, out_dtype=jnp.float32)


def prepare_projection_mlp_params(params):
    """One-time cast of weights to bf16 (MXU operand dtype) so the forward pass
    never pays a per-call f32->bf16 conversion over the weight bytes."""
    out = dict(params)
    for k in ("w1", "w2", "w3"):
        out[k] = params[k].astype(jnp.bfloat16)
    return out


def init_projection_mlp_params(key, in_dim, out_dim):
    """Init matching nn.Linear / nn.BatchNorm1d default shapes (W stored as (fan_in, fan_out))."""
    hidden_dim = out_dim

    def linear(k, fan_in, fan_out):
        bound = 1.0 / (fan_in ** 0.5)
        kw, kb = jax.random.split(k)
        w = jax.random.uniform(kw, (fan_in, fan_out), jnp.float32, -bound, bound)
        b = jax.random.uniform(kb, (1, fan_out), jnp.float32, -bound, bound)
        return w, b

    k1, k2, k3 = jax.random.split(key, 3)
    w1, b1 = linear(k1, in_dim, hidden_dim)
    w2, b2 = linear(k2, hidden_dim, hidden_dim)
    w3, b3 = linear(k3, hidden_dim, out_dim)
    g1 = jnp.ones((1, hidden_dim), jnp.float32)
    be1 = jnp.zeros((1, hidden_dim), jnp.float32)
    g2 = jnp.ones((1, hidden_dim), jnp.float32)
    be2 = jnp.zeros((1, hidden_dim), jnp.float32)
    return dict(w1=w1, b1=b1, g1=g1, be1=be1,
                w2=w2, b2=b2, g2=g2, be2=be2,
                w3=w3, b3=b3)


def projection_mlp_ref(x, params, num_layers=2):
    """Plain-JAX reference. Mirrors the kernel's bf16 MXU operands and bf16
    intermediates, but keeps the Linear biases and the un-folded two-pass BN
    formula, verifying that the kernel's algebraic simplifications are exact
    (up to fp rounding)."""
    def layer(h, w, b, g=None, be=None, relu=False):
        z = jnp.dot(h.astype(jnp.bfloat16), w.astype(jnp.bfloat16),
                    preferred_element_type=jnp.float32) + b
        mu = jnp.mean(z, axis=0, keepdims=True)
        var = jnp.mean((z - mu) ** 2, axis=0, keepdims=True)
        zn = (z - mu) / jnp.sqrt(var + BN_EPS)
        if g is not None:
            zn = zn * g + be
        if relu:
            zn = jnp.maximum(zn, 0.0)
        return zn

    h = layer(x, params["w1"], params["b1"], params["g1"], params["be1"], relu=True)
    h = h.astype(jnp.bfloat16)  # kernel emits bf16 between layers
    if num_layers == 3:
        h = layer(h, params["w2"], params["b2"], params["g2"], params["be2"], relu=True)
        h = h.astype(jnp.bfloat16)
    return layer(h, params["w3"], params["b3"])


if __name__ == "__main__":
    # Small but lane-aligned demo shapes (features multiple of 128, real batch
    # on the sublane axis so BN stats are meaningful and stores are unmasked).
    B, IN_DIM, OUT_DIM = 32, 256, 256

    key = jax.random.PRNGKey(0)
    kx, kp = jax.random.split(key)
    x = jax.random.normal(kx, (B, IN_DIM), jnp.float32)
    params = init_projection_mlp_params(kp, IN_DIM, OUT_DIM)
    kparams = prepare_projection_mlp_params(params)   # bf16 weights, cast once

    proj2 = jax.jit(functools.partial(projection_mlp, num_layers=2))
    proj3 = jax.jit(functools.partial(projection_mlp, num_layers=3))

    # num_layers = 2 (module default)
    out2 = jax.block_until_ready(proj2(x, kparams))
    ref2 = projection_mlp_ref(x, params, num_layers=2)
    assert out2.shape == (B, OUT_DIM)
    assert jnp.allclose(out2, ref2, atol=1e-2, rtol=1e-2), "mismatch vs reference (2 layers)"

    # num_layers = 3 path
    out3 = jax.block_until_ready(proj3(x, kparams))
    ref3 = projection_mlp_ref(x, params, num_layers=3)
    assert out3.shape == (B, OUT_DIM)
    assert jnp.allclose(out3, ref3, atol=1e-2, rtol=1e-2), "mismatch vs reference (3 layers)"

    # TODO(synk): BatchNorm running_mean/running_var buffer updates (training-time
    # side effect) are not materialized; only the forward output is produced.
    print("KERNEL_OK")
</pallas_src>

<mosaic_0001>
module attributes {stable_mosaic.version = 11 : i64} {
  func.func @_linear_bn_act_kernel(%arg0: i32, %arg1: memref<32x256xbf16, #tpu.memory_space<vmem>>, %arg2: memref<256x128xbf16, #tpu.memory_space<vmem>>, %arg3: memref<1x128xf32, #tpu.memory_space<vmem>>, %arg4: memref<1x128xf32, #tpu.memory_space<vmem>>, %arg5: memref<32x128xbf16, #tpu.memory_space<vmem>>) attributes {dimension_semantics = [#tpu.dimension_semantics<parallel>], iteration_bounds = array<i64: 2>, scalar_prefetch = 0 : i64, scratch_operands = 0 : i64, tpu.core_type = #tpu.core_type<tc>, window_params = [{pipeline_mode = #tpu.pipeline_mode<synchronous>, transform_indices = @transform_0, window_bounds = array<i64: 32, 256>}, {transform_indices = @transform_1, window_bounds = array<i64: 256, 128>}, {transform_indices = @transform_2, window_bounds = array<i64: 1, 128>}, {transform_indices = @transform_3, window_bounds = array<i64: 1, 128>}, {transform_indices = @transform_4, window_bounds = array<i64: 32, 128>}]} {
    %c0 = arith.constant 0 : index
    %c0_0 = arith.constant 0 : index
    %0 = vector.load %arg1[%c0, %c0_0] : memref<32x256xbf16, #tpu.memory_space<vmem>>, vector<32x256xbf16>
    %c0_1 = arith.constant 0 : index
    %c0_2 = arith.constant 0 : index
    %1 = vector.load %arg2[%c0_1, %c0_2] : memref<256x128xbf16, #tpu.memory_space<vmem>>, vector<256x128xbf16>
    %cst = arith.constant dense<0.000000e+00> : vector<32x128xf32>
    %2 = tpu.matmul %0, %1, %cst {dimension_numbers = #tpu.dot_dimension_numbers<[1], [0], [0], [1], [0, 0, 1, 1], [], []>} : vector<32x256xbf16>, vector<256x128xbf16>, vector<32x128xf32> -> vector<32x128xf32>
    %cst_3 = arith.constant dense<0.000000e+00> : vector<128xf32>
    %3 = vector.multi_reduction <add>, %2, %cst_3 [0] : vector<32x128xf32> to vector<128xf32>
    %4 = vector.shape_cast %3 : vector<128xf32> to vector<1x128xf32>
    %cst_4 = arith.constant 3.200000e+01 : f32
    %5 = vector.broadcast %cst_4 : f32 to vector<1x128xf32>
    %6 = arith.divf %4, %5 : vector<1x128xf32>
    %7 = arith.mulf %2, %2 : vector<32x128xf32>
    %cst_5 = arith.constant dense<0.000000e+00> : vector<128xf32>
    %8 = vector.multi_reduction <add>, %7, %cst_5 [0] : vector<32x128xf32> to vector<128xf32>
    %9 = vector.shape_cast %8 : vector<128xf32> to vector<1x128xf32>
    %cst_6 = arith.constant 3.200000e+01 : f32
    %10 = vector.broadcast %cst_6 : f32 to vector<1x128xf32>
    %11 = arith.divf %9, %10 : vector<1x128xf32>
    %12 = arith.mulf %6, %6 : vector<1x128xf32>
    %13 = arith.subf %11, %12 : vector<1x128xf32>
    %cst_7 = arith.constant 0.000000e+00 : f32
    %14 = vector.broadcast %cst_7 : f32 to vector<1x128xf32>
    %15 = arith.maximumf %13, %14 : vector<1x128xf32>
    %cst_8 = arith.constant 9.99999974E-6 : f32
    %16 = vector.broadcast %cst_8 : f32 to vector<1x128xf32>
    %17 = arith.addf %15, %16 : vector<1x128xf32>
    %18 = math.rsqrt %17 : vector<1x128xf32>
    %c0_9 = arith.constant 0 : index
    %c0_10 = arith.constant 0 : index
    %19 = vector.load %arg3[%c0_9, %c0_10] : memref<1x128xf32, #tpu.memory_space<vmem>>, vector<1x128xf32>
    %20 = arith.mulf %19, %18 : vector<1x128xf32>
    %c0_11 = arith.constant 0 : index
    %c0_12 = arith.constant 0 : index
    %21 = vector.load %arg4[%c0_11, %c0_12] : memref<1x128xf32, #tpu.memory_space<vmem>>, vector<1x128xf32>
    %22 = arith.mulf %6, %20 : vector<1x128xf32>
    %23 = arith.subf %21, %22 : vector<1x128xf32>
    %24 = vector.broadcast %20 : vector<1x128xf32> to vector<32x128xf32>
    %25 = arith.mulf %2, %24 : vector<32x128xf32>
    %26 = vector.broadcast %23 : vector<1x128xf32> to vector<32x128xf32>
    %27 = arith.addf %25, %26 : vector<32x128xf32>
    %cst_13 = arith.constant 0.000000e+00 : f32
    %28 = vector.broadcast %cst_13 : f32 to vector<32x128xf32>
    %29 = arith.maximumf %27, %28 : vector<32x128xf32>
    %30 = arith.truncf %29 : vector<32x128xf32> to vector<32x128xbf16>
    %c0_14 = arith.constant 0 : index
    %c0_15 = arith.constant 0 : index
    %31 = vector.load %arg5[%c0_14, %c0_15] : memref<32x128xbf16, #tpu.memory_space<vmem>>, vector<32x128xbf16>
    tpu.vector_store %arg5[%c0_14, %c0_15], %30 {strides = array<i32>} : memref<32x128xbf16, #tpu.memory_space<vmem>>, vector<32x128xbf16>,
    return
  }
  func.func @transform_0(%arg0: i32) -> (i32, i32) {
    %c0_i32 = arith.constant 0 : i32
    %c0_i32_0 = arith.constant 0 : i32
    %c0_i32_1 = arith.constant 0 : i32
    return %c0_i32, %c0_i32_0 : i32, i32
  }
  func.func @transform_1(%arg0: i32) -> (i32, i32) {
    %c0_i32 = arith.constant 0 : i32
    %c0_i32_0 = arith.constant 0 : i32
    return %c0_i32, %arg0 : i32, i32
  }
  func.func @transform_2(%arg0: i32) -> (i32, i32) {
    %c0_i32 = arith.constant 0 : i32
    %c0_i32_0 = arith.constant 0 : i32
    return %c0_i32, %arg0 : i32, i32
  }
  func.func @transform_3(%arg0: i32) -> (i32, i32) {
    %c0_i32 = arith.constant 0 : i32
    %c0_i32_0 = arith.constant 0 : i32
    return %c0_i32, %arg0 : i32, i32
  }
  func.func @transform_4(%arg0: i32) -> (i32, i32) {
    %c0_i32 = arith.constant 0 : i32
    %c0_i32_0 = arith.constant 0 : i32
    return %c0_i32, %arg0 : i32, i32
  }
}

module attributes {stable_mosaic.version = 11 : i64} {
  func.func @_linear_bn_act_kernel(%arg0: i32, %arg1: memref<32x256xbf16, #tpu.memory_space<vmem>>, %arg2: memref<256x128xbf16, #tpu.memory_space<vmem>>, %arg3: memref<32x128xf32, #tpu.memory_space<vmem>>) attributes {dimension_semantics = [#tpu.dimension_semantics<parallel>], iteration_bounds = array<i64: 2>, scalar_prefetch = 0 : i64, scratch_operands = 0 : i64, tpu.core_type = #tpu.core_type<tc>, window_params = [{pipeline_mode = #tpu.pipeline_mode<synchronous>, transform_indices = @transform_0, window_bounds = array<i64: 32, 256>}, {transform_indices = @transform_1, window_bounds = array<i64: 256, 128>}, {transform_indices = @transform_2, window_bounds = array<i64: 32, 128>}]} {
    %c0 = arith.constant 0 : index
    %c0_0 = arith.constant 0 : index
    %0 = vector.load %arg1[%c0, %c0_0] : memref<32x256xbf16, #tpu.memory_space<vmem>>, vector<32x256xbf16>
    %c0_1 = arith.constant 0 : index
    %c0_2 = arith.constant 0 : index
    %1 = vector.load %arg2[%c0_1, %c0_2] : memref<256x128xbf16, #tpu.memory_space<vmem>>, vector<256x128xbf16>
    %cst = arith.constant dense<0.000000e+00> : vector<32x128xf32>
    %2 = tpu.matmul %0, %1, %cst {dimension_numbers = #tpu.dot_dimension_numbers<[1], [0], [0], [1], [0, 0, 1, 1], [], []>} : vector<32x256xbf16>, vector<256x128xbf16>, vector<32x128xf32> -> vector<32x128xf32>
    %cst_3 = arith.constant dense<0.000000e+00> : vector<128xf32>
    %3 = vector.multi_reduction <add>, %2, %cst_3 [0] : vector<32x128xf32> to vector<128xf32>
    %4 = vector.shape_cast %3 : vector<128xf32> to vector<1x128xf32>
    %cst_4 = arith.constant 3.200000e+01 : f32
    %5 = vector.broadcast %cst_4 : f32 to vector<1x128xf32>
    %6 = arith.divf %4, %5 : vector<1x128xf32>
    %7 = arith.mulf %2, %2 : vector<32x128xf32>
    %cst_5 = arith.constant dense<0.000000e+00> : vector<128xf32>
    %8 = vector.multi_reduction <add>, %7, %cst_5 [0] : vector<32x128xf32> to vector<128xf32>
    %9 = vector.shape_cast %8 : vector<128xf32> to vector<1x128xf32>
    %cst_6 = arith.constant 3.200000e+01 : f32
    %10 = vector.broadcast %cst_6 : f32 to vector<1x128xf32>
    %11 = arith.divf %9, %10 : vector<1x128xf32>
    %12 = arith.mulf %6, %6 : vector<1x128xf32>
    %13 = arith.subf %11, %12 : vector<1x128xf32>
    %cst_7 = arith.constant 0.000000e+00 : f32
    %14 = vector.broadcast %cst_7 : f32 to vector<1x128xf32>
    %15 = arith.maximumf %13, %14 : vector<1x128xf32>
    %cst_8 = arith.constant 9.99999974E-6 : f32
    %16 = vector.broadcast %cst_8 : f32 to vector<1x128xf32>
    %17 = arith.addf %15, %16 : vector<1x128xf32>
    %18 = math.rsqrt %17 : vector<1x128xf32>
    %19 = arith.mulf %6, %18 : vector<1x128xf32>
    %cst_9 = arith.constant 0.000000e+00 : f32
    %20 = vector.broadcast %cst_9 : f32 to vector<1x128xf32>
    %21 = arith.subf %20, %19 : vector<1x128xf32>
    %22 = vector.broadcast %18 : vector<1x128xf32> to vector<32x128xf32>
    %23 = arith.mulf %2, %22 : vector<32x128xf32>
    %24 = vector.broadcast %21 : vector<1x128xf32> to vector<32x128xf32>
    %25 = arith.addf %23, %24 : vector<32x128xf32>
    %c0_10 = arith.constant 0 : index
    %c0_11 = arith.constant 0 : index
    %26 = vector.load %arg3[%c0_10, %c0_11] : memref<32x128xf32, #tpu.memory_space<vmem>>, vector<32x128xf32>
    tpu.vector_store %arg3[%c0_10, %c0_11], %25 {strides = array<i32>} : memref<32x128xf32, #tpu.memory_space<vmem>>, vector<32x128xf32>,
    return
  }
  func.func @transform_0(%arg0: i32) -> (i32, i32) {
    %c0_i32 = arith.constant 0 : i32
    %c0_i32_0 = arith.constant 0 : i32
    %c0_i32_1 = arith.constant 0 : i32
    return %c0_i32, %c0_i32_0 : i32, i32
  }
  func.func @transform_1(%arg0: i32) -> (i32, i32) {
    %c0_i32 = arith.constant 0 : i32
    %c0_i32_0 = arith.constant 0 : i32
    return %c0_i32, %arg0 : i32, i32
  }
  func.func @transform_2(%arg0: i32) -> (i32, i32) {
    %c0_i32 = arith.constant 0 : i32
    %c0_i32_0 = arith.constant 0 : i32
    return %c0_i32, %arg0 : i32, i32
  }
}

</mosaic_0001>

<bundles_post_ra>
// kernel: projection_mlp.2
= control target key start
LH: loop header
LB: loop body
LE: loop exit
PB: predicated region body
PF: predicated region fallthrough
CT: control target
= control target key end

     0   :  { %s1281_s0 = inlined_call_operand.vmem [shape: bf16[32,256], index: 0, kind: input, shape index: {}]   ;;  %s1282_s1 = inlined_call_operand.hbm [shape: bf16[256,256], index: 1, kind: input, shape index: {}]   ;;  %s1283_s2 = inlined_call_operand.hbm [shape: f32[1,256], index: 2, kind: input, shape index: {}]   ;;  %s1284_s3 = inlined_call_operand.hbm [shape: f32[1,256], index: 3, kind: input, shape index: {}]   ;;  %s1285_s4 = inlined_call_operand.vmem [shape: bf16[32,256], index: 4, kind: output, shape index: {}]  }
   0x1   :  { %1288 = sst [smem:[#allocation10_spill]] %s1282_s1 }
   0x2   :  { %9 = vsyncpa [#allocation3], 0 }
   0x3   :  { %11 = vsyncpa [#allocation3 + $0x1], 0 }
   0x4   :  { %12 = vsyncpa [#allocation5], 0 }
   0x5   :  { %14 = vsyncpa [#allocation5 + $0x1], 0  ;;  %s1050_s15 = smov 0   ;;  %s1052_s16 = smov 0  }
   0x6   :  { %s1054_s17 = smov 0   ;;  %s1056_s18 = smov 0  }
   0x7 LB: > { %s1069_s19 = sadd.s32 4294967295, %s1017_s18   ;;  %s1072_s20 = sadd.s32 1, %s1017_s18   ;;  %s1017_s18 = sphi %s1056_s18, %s1302_s18   ;;  %s1013_s17 = sphi %s1054_s17, %s1301_s17   ;;  %s1009_s16 = sphi %s1052_s16, %s1300_s16   ;;  %s1005_s15 = sphi %s1050_s15, %s1299_s15  }
   0x8   : > { %s45_s21 = ssub.s32 %s1017_s18, %s1072_s20  ;;  %s48_s22 = sadd.s32 1, %s1013_s17 }
   0x9   : > { %p46_p0 = scmp.eq.s32.totalorder %s45_s21, 0  ;;  %p55_p1 = scmp.ne.s32.totalorder %s1013_s17, %s1009_s16 }
   0xa   : > { %p56_p2 = scmp.eq.s32.totalorder %s1017_s18, 0  ;;  %p61_p3 = scmp.ne.s32.totalorder %s1009_s16, %s1005_s15 }
   0xb   : > { %s1082_s23 = scalar_select %p46_p0, %s1013_s17, %s48_s22  }
   0xc   : > { %p57_p4 = por %p56_p2, %p55_p1  ;;  %p62_p5 = scmp.eq.s32.totalorder %s1069_s19, 0 }
   0xd   : > { %p137_p6 = scmp.eq.s32.totalorder %s1069_s19, 1  ;;  %p829_p8 = scmp.lt.s32.totalorder %s1017_s18, 2 }
   0xe   : > { %p1086_p7 = por %p62_p5, %p61_p3  ;;  %s1096_s26 = sand.u32 1, %s1013_s17  }
   0xf   : > { %p1091_p9 = por %p137_p6, %p55_p1  ;;  %s719_s27 = sshll.u32 %s1096_s26, 7 }
  0x10   : > { %s1289_s24 = scalar_select %p1086_p7, 1, 0 }
  0x11   : > { %s1290_s25 = scalar_select %p1091_p9, 1, 0 }
  0x12   : > { %p1099_p10 = pnand %p829_p8, %p57_p4  ;;  %s186_s29 = sand.u32 1, %s1017_s18  }
  0x13   : > { %s721_s30 = sshll.u32 %s1017_s18, 4  ;;  %s189_s5 = scalar_lea.vmem [#allocation4], %s1096_s26 }
  0x14   : > { %s1291_s28 = scalar_select %p1099_p10, 1, 0 }
  0x15   : > { %s196_s6 = sshll.u32 %s189_s5, 4  ;;  %s1111_s9 = scalar_lea.hbm %s1283_s2, %s721_s30  ;;  %s1113_s6 = int_to_ptr.vmem [resolvable:$true] %s196_s6 }
  0x16   : > { %s1115_s10 = scalar_lea.sflag [#allocation5], %s186_s29  ;;  %s889_s11 = scalar_lea.hbm %s1111_s9, 16 }
  0x17   : > { %p890_p11 = scmp.ne.s32.totalorder %s1111_s9, %s889_s11  ;;  %p1121_p12 = pneg %p1099_p10 }
  0x18   : > { %s894_s15 = scalar_lea.hbm %s1283_s2, 32  ;;  %p895_p1 = scmp.lt.u32.totalorder %s1111_s9, %s1283_s2 }
  0x19   : > { %p892_p13 = pnand %p1121_p12, %p890_p11  ;;  %p896_p2 = scmp.lt.u32.totalorder %s894_s15, %s889_s11 }
  0x1a   : > { %p898_p4 = scmp.lt.u32.totalorder %s889_s11, %s1111_s9 }
  0x1b   : > { %p893_p0 = pneg %p892_p13  ;;  %p897_p3 = por %p896_p2, %p895_p1 }
  0x1d   : > { %p899_p5 = por %p898_p4, %p897_p3 }
  0x1f   : > { %p900_p6 = pnand %p899_p5, %p893_p0 }
  0x21   : > { %903 = shalt.err (!%p900_p6)
}
  0x22   : > { %s904_s29 = scalar_lea.vmem %s1113_s6, 16  ;;  %s1019_s5 = smov [#allocation4]  }
  0x23   : > { %p905_p8 = scmp.ne.s32.totalorder %s1113_s6, %s904_s29  ;;  %s909_s7 = sshll.u32 %s1019_s5, 4  ;;  %s910_s7 = int_to_ptr.vmem [resolvable:$false] %s909_s7 }
  0x24   : > { %s911_s8 = scalar_lea.vmem %s910_s7, 32  ;;  %p912_p9 = scmp.lt.s32.totalorder %s1113_s6, %s910_s7 }
  0x25   : > { %p907_p11 = pnand %p905_p8, %p1121_p12  ;;  %p913_p7 = scmp.lt.s32.totalorder %s911_s8, %s904_s29 }
  0x27   : > { %p908_p13 = pneg %p907_p11  ;;  %p914_p1 = por %p913_p7, %p912_p9 }
  0x29   : > { %p915_p2 = pnand %p914_p1, %p908_p13 }
  0x2b   : > { %918 = shalt.err (!%p915_p2)
}
  0x2c   : > { %825 = dma.hbm_to_vmem [thread:$0]  (!%p1099_p10), %s1111_s9, 16, %s1113_s6, %s1115_s10  }
  0x2d   : > { %s1150_s14 = scalar_lea.hbm %s1284_s3, %s721_s30  ;;  %p723_p7 = scmp.ge.s32.totalorder %s1017_s18, 1 }
  0x2e   : > { %p218_p9 = scmp.lt.s32.totalorder %s1017_s18, 3  ;;  %s720_s15 = sshll.u32 %s1017_s18, 6 }
  0x2f   : > { %s1294_s1 = sld [smem:[#allocation10_spill]]  ;;  %s170_s6 = scalar_lea.vmem [#allocation2], %s719_s27 }
  0x30   : > { %p1155_p0 = pnand %p723_p7, %p218_p9  ;;  %s176_s30 = sshll.u32 %s170_s6, 4  ;;  %s1166_s30 = int_to_ptr.vmem [resolvable:$true] %s176_s30 }
  0x31   : > { %s167_s9 = scalar_lea.sflag [#allocation3], %s1096_s26 }
  0x32   : > { %s1293_s21 = scalar_select %p1155_p0, 1, 0 }
  0x35   : > { %s1162_s5 = scalar_lea.hbm %s1294_s1, %s720_s15  ;;  %s924_s11 = scalar_lea.hbm %s1294_s1, 4096 }
  0x36   : > { %s919_s18 = scalar_lea.hbm %s1162_s5, 2048  ;;  %p925_p6 = scmp.lt.u32.totalorder %s1162_s5, %s1294_s1 }
  0x37   : > { %p920_p3 = scmp.ne.s32.totalorder %s1162_s5, %s919_s18  ;;  %p926_p8 = scmp.lt.u32.totalorder %s924_s11, %s919_s18 }
  0x38   : > { %p928_p13 = scmp.lt.u32.totalorder %s919_s18, %s1162_s5 }
  0x39   : > { %p922_p4 = pnand %p920_p3, %p1121_p12  ;;  %p927_p11 = por %p926_p8, %p925_p6 }
  0x3b   : > { %p923_p5 = pneg %p922_p4  ;;  %p929_p1 = por %p928_p13, %p927_p11 }
  0x3d   : > { %p930_p2 = pnand %p929_p1, %p923_p5 }
  0x3f   : > { %933 = shalt.err (!%p930_p2)
}
  0x40   : > { %s934_s27 = scalar_lea.vmem %s1166_s30, 2048  ;;  %s1020_s22 = smov [#allocation2]  }
  0x41   : > { %p935_p7 = scmp.ne.s32.totalorder %s1166_s30, %s934_s27  ;;  %s939_s29 = sshll.u32 %s1020_s22, 4  ;;  %s940_s29 = int_to_ptr.vmem [resolvable:$false] %s939_s29 }
  0x42   : > { %s941_s6 = scalar_lea.vmem %s940_s29, 4096  ;;  %p942_p4 = scmp.lt.s32.totalorder %s1166_s30, %s940_s29 }
  0x43   : > { %p937_p9 = pnand %p935_p7, %p1121_p12  ;;  %p943_p0 = scmp.lt.s32.totalorder %s941_s6, %s934_s27 }
  0x45   : > { %p938_p3 = pneg %p937_p9  ;;  %p944_p6 = por %p943_p0, %p942_p4 }
  0x47   : > { %p945_p8 = pnand %p944_p6, %p938_p3 }
  0x49   : > { %948 = shalt.err (!%p945_p8)
}
  0x4a   : > { %s1021_s18 = smov 128   ;;  %s1022_s7 = smov 64  }
  0x4b   : > { %s1023_s8 = smov 4   ;;  %s206_s11 = scalar_lea.vmem [#allocation6], %s1096_s26 }
  0x4c   : > { %822 = dma.hbm_to_vmem [thread:$0]  (!%p1099_p10), %s1162_s5, 2048, %s1166_s30, %s167_s9, %s1021_s18, %s1022_s7, %s1023_s8  }
  0x4d   : > { %s213_s13 = sshll.u32 %s206_s11, 4  ;;  %s949_s15 = scalar_lea.hbm %s1150_s14, 16  ;;  %s214_s13 = int_to_ptr.vmem [resolvable:$true] %s213_s13 }
  0x4e   : > { %p950_p0 = scmp.ne.s32.totalorder %s1150_s14, %s949_s15  ;;  %s954_s29 = scalar_lea.hbm %s1284_s3, 32 }
  0x4f   : > { %p955_p13 = scmp.lt.u32.totalorder %s1150_s14, %s1284_s3  ;;  %p956_p1 = scmp.lt.u32.totalorder %s954_s29, %s949_s15 }
  0x50   : > { %p952_p5 = pnand %p950_p0, %p1121_p12  ;;  %p958_p7 = scmp.lt.u32.totalorder %s949_s15, %s1150_s14 }
  0x51   : > { %p957_p2 = por %p956_p1, %p955_p13 }
  0x52   : > { %p953_p11 = pneg %p952_p5 }
  0x53   : > { %p959_p9 = por %p958_p7, %p957_p2 }
  0x55   : > { %p960_p3 = pnand %p959_p9, %p953_p11 }
  0x57   : > { %963 = shalt.err (!%p960_p3)
}
  0x58   : > { %s964_s26 = scalar_lea.vmem %s214_s13, 16  ;;  %s1024_s5 = smov [#allocation6]  }
  0x59   : > { %p965_p4 = scmp.ne.s32.totalorder %s214_s13, %s964_s26  ;;  %s969_s30 = sshll.u32 %s1024_s5, 4  ;;  %s970_s30 = int_to_ptr.vmem [resolvable:$false] %s969_s30 }
  0x5a   : > { %s971_s9 = scalar_lea.vmem %s970_s30, 32  ;;  %p972_p0 = scmp.lt.s32.totalorder %s214_s13, %s970_s30 }
  0x5b   : > { %p967_p6 = pnand %p965_p4, %p1121_p12  ;;  %p973_p5 = scmp.lt.s32.totalorder %s971_s9, %s964_s26 }
  0x5d   : > { %p968_p8 = pneg %p967_p6  ;;  %p974_p10 = por %p973_p5, %p972_p0 }
  0x5f   : > { %p975_p1 = pnand %p974_p10, %p968_p8 }
  0x61   : > { %978 = shalt.err (!%p975_p1)
}
  0x62   : > { %p1295_p13 = scmp.ne.s32.totalorder %s1291_s28, 0  ;;  %p1296_p11 = scmp.ne.s32.totalorder %s1293_s21, 0 }
  0x63   : > { %s1214_s1 = sand.u32 (!%p1296_p11), 1, %s1009_s16   ;;  %p1297_p10 = scmp.ne.s32.totalorder (!%p1296_p11), %s1289_s24, 0 }
  0x64   : > { %828 = dma.hbm_to_vmem [thread:$0]  (!%p1295_p13), %s1150_s14, 16, %s214_s13, %s1115_s10  }
  0x65   : > { %222 = sbr.rel (%p1296_p11) target bundleno = 425 (0x1a9), region = 36  ;;  %s724_s12 = sshll.u32 (!%p1296_p11), %s1214_s1, 7 }
  0x66   : > { %s225_s18 = scalar_lea.sflag (!%p1296_p11), [#allocation3], %s1214_s1  ;;  %s1218_s7 = scalar_lea.vmem (!%p1296_p11), [#allocation2], %s724_s12 }
  0x6c   : > { %996 = dma.done.wait (%p1297_p10), %s225_s18, 2048  }
  0x6d   : > { %998 = vsyncadd (%p1297_p10), %s225_s18, 4294965248  ;;  %s233_s28 = sand.u32 1, %s1069_s19   ;;  %s236_s14 = scalar_lea.vmem [#allocation4], %s1214_s1 }
  0x6e   : > { %s234_s10 = scalar_lea.sflag [#allocation5], %s233_s28 }
  0x6f   : > { %1000 = dma.done.wait (%p1297_p10), %s234_s10, 32  }
  0x70   : > { %1002 = vsyncadd (%p1297_p10), %s234_s10, 4294967264  ;;  %v865_v0 = vld [vmem:[%s1218_s7 + $0x40] sm:$0xff]   ;;  %v867_v2 = vld [vmem:[%s1218_s7 + $0x48] sm:$0xff]   ;;  %v514_v60 = vlaneseq  ;;  %s244_s29 = scalar_lea.vmem [#allocation6], %s1214_s1  ;;  %s725_s6 = sshll.u32 %s1214_s1, 4 }
  0x71   : > { %v866_v1 = vld [vmem:[%s1218_s7] sm:$0xff]   ;;  %769 = vmatprep.subr.bf16.mxu0 %v865_v0  ;;  %797 = vmatprep.subr.bf16.mxu1 %v865_v0  ;;  %v868_v3 = vld [vmem:[%s1218_s7 + $0x8] sm:$0xff]   ;;  %v869_v4 = vld [vmem:[%s1218_s7 + $0x50] sm:$0xff]   ;;  %s275_s26 = scalar_lea.vmem [#allocation7], %s725_s6  ;;  %p1298_p12 = scmp.ne.s32.totalorder %s1290_s25, 0 }
  0x72   : > { %770 = vmatpush3.bf16.msra.mxu0 %v866_v1  ;;  %805 = vmatpush3.bf16.msra.mxu1 %v866_v1  ;;  %v870_v5 = vld [vmem:[%s1218_s7 + $0x10] sm:$0xff]   ;;  %v871_v6 = vld [vmem:[%s1218_s7 + $0x58] sm:$0xff]   ;;  %v873_v8 = vld [vmem:[%s1218_s7 + $0x60] sm:$0xff]   ;;  %v515_v61 = vshrl.u32 %v514_v60, 7  ;;  %s751_s5 = sshll.u32 (%p1298_p12), %s1069_s19, 2 }
  0x73   : > { %771 = vmatprep.subr.bf16.mxu0 %v867_v2  ;;  %798 = vmatprep.subr.bf16.mxu1 %v867_v2  ;;  %v872_v7 = vld [vmem:[%s1218_s7 + $0x18] sm:$0xff]   ;;  %v874_v9 = vld [vmem:[%s1218_s7 + $0x20] sm:$0xff]   ;;  %v875_v10 = vld [vmem:[%s1218_s7 + $0x68] sm:$0xff]   ;;  %s565_s1 = scalar_lea.vmem (%p1298_p12), %s1285_s4, %s751_s5 }
  0x74   : > { %v883_v11 = vld [vmem:[%s1281_s0 + $0x4] ss:$8 sps:$4 sm:$0xff]   ;;  %v886_v12 = vld [vmem:[%s1281_s0 + $0x14] ss:$8 sps:$4 sm:$0xff]   ;;  %v881_v18 = vld [vmem:[%s1281_s0] ss:$8 sps:$4 sm:$0xff]  }
  0x75   : > { %v876_v13 = vld [vmem:[%s1218_s7 + $0x28] sm:$0xff]   ;;  %v877_v14 = vld [vmem:[%s1218_s7 + $0x70] sm:$0xff]   ;;  %461 = vmatprep.mubr.bf16.mxu0 %v883_v11  ;;  %469 = vmatprep.mubr.bf16.mxu1 %v886_v12  ;;  %v879_v16 = vld [vmem:[%s1218_s7 + $0x78] sm:$0xff]   ;;  %v516_v63 = vsub.s32 0, %v515_v61 }
  0x76   : > { %772 = vmatpush3.bf16.msra.mxu0 %v868_v3  ;;  %806 = vmatpush3.bf16.msra.mxu1 %v868_v3  ;;  %v878_v15 = vld [vmem:[%s1218_s7 + $0x30] sm:$0xff]   ;;  %v880_v17 = vld [vmem:[%s1218_s7 + $0x38] sm:$0xff]   ;;  %v508_v62 = vld [vmem:[%s236_s14] sm:$0x1] }
  0x77   : > { %773 = vmatprep.subr.bf16.mxu0 %v869_v4  ;;  %799 = vmatprep.subr.bf16.mxu1 %v869_v4  ;;  %v884_v19 = vld [vmem:[%s1281_s0 + $0x10] ss:$8 sps:$4 sm:$0xff]   ;;  %v510_v2 = vld [vmem:[%s244_s29] sm:$0x1] }
  0x7a   : > { %774 = vmatpush3.bf16.msra.mxu0 %v870_v5  ;;  %807 = vmatpush3.bf16.msra.mxu1 %v870_v5 }
  0x7b   : > { %775 = vmatprep.subr.bf16.mxu0 %v871_v6  ;;  %800 = vmatprep.subr.bf16.mxu1 %v871_v6 }
  0x7e   : > { %776 = vmatpush3.bf16.msra.mxu0 %v872_v7  ;;  %808 = vmatpush3.bf16.msra.mxu1 %v872_v7 }
  0x7f   : > { %777 = vmatprep.subr.bf16.mxu0 %v873_v8  ;;  %801 = vmatprep.subr.bf16.mxu1 %v873_v8 }
  0x82   : > { %778 = vmatpush3.bf16.msra.mxu0 %v874_v9  ;;  %809 = vmatpush3.bf16.msra.mxu1 %v874_v9 }
  0x83   : > { %779 = vmatprep.subr.bf16.mxu0 %v875_v10  ;;  %802 = vmatprep.subr.bf16.mxu1 %v875_v10 }
  0x86   : > { %780 = vmatpush3.bf16.msra.mxu0 %v876_v13  ;;  %810 = vmatpush3.bf16.msra.mxu1 %v876_v13 }
  0x87   : > { %781 = vmatprep.subr.bf16.mxu0 %v877_v14  ;;  %803 = vmatprep.subr.bf16.mxu1 %v877_v14 }
  0x8a   : > { %782 = vmatpush3.bf16.msra.mxu0 %v878_v15  ;;  %811 = vmatpush3.bf16.msra.mxu1 %v878_v15 }
  0x8b   : > { %783 = vmatprep.subr.bf16.mxu0 %v879_v16  ;;  %804 = vmatprep.subr.bf16.mxu1 %v879_v16 }
  0x8e   : > { %784 = vmatpush3.bf16.msra.mxu0 %v880_v17  ;;  %812 = vmatpush3.bf16.msra.mxu1 %v880_v17 }
  0x91   : > { %462 = vmatmul.mubr.bf16.vlgmr.msra.gmra.mrb[0].mxu0 %v881_v18  ;;  %470 = vmatmul.mubr.bf16.vlgmr.msra.gmra.mrb[0].mxu1 %v884_v19 }
 0x164   : > { %v785_v20 = vpop.f32.mrb[0].mxu0  ;;  %v791_v21 = vpop.f32.mrb[0].mxu1 }
 0x165   : > { %v786_v22 = vpop.f32.mrb[1].mxu0  ;;  %v792_v23 = vpop.f32.mrb[1].mxu1 }
 0x166   : > { %v787_v24 = vadd.f32 %v786_v22, %v785_v20  ;;  %v788_v25 = vpop.f32.mrb[2].mxu0  ;;  %v793_v26 = vadd.f32 %v792_v23, %v791_v21  ;;  %v794_v27 = vpop.f32.mrb[2].mxu1 }
 0x167   : > { %v789_v28 = vpop.f32.mrb[3].mxu0  ;;  %v795_v29 = vpop.f32.mrb[3].mxu1 }
 0x168   : > { %v790_v30 = vadd.f32 %v789_v28, %v788_v25  ;;  %v796_v31 = vadd.f32 %v795_v29, %v794_v27  ;;  %v489_v32 = vmul.f32 %v787_v24, %v787_v24  ;;  %v491_v33 = vmul.f32 %v793_v26, %v793_v26 }
 0x16a   : > { %v478_v34 = vadd.f32 %v790_v30, %v787_v24  ;;  %v490_v35 = vmul.f32 %v790_v30, %v790_v30  ;;  %v492_v39 = vmul.f32 %v796_v31, %v796_v31 }
 0x16c   : > { %v493_v36 = vadd.f32 %v490_v35, %v489_v32  ;;  %v479_v37 = vadd.f32 %v793_v26, %v478_v34 }
 0x16e   : > { %v480_v38 = vadd.f32 %v796_v31, %v479_v37  ;;  %v494_v40 = vadd.f32 %v493_v36, %v491_v33 }
 0x170   : > { %v481_v41 = vrot.slane %v480_v38, 4  ;;  %v495_v42 = vadd.f32 %v494_v40, %v492_v39 }
 0x172   : > { %v482_v43 = vadd.f32 %v481_v41, %v480_v38  ;;  %v496_v44 = vrot.slane %v495_v42, 4 }
 0x174   : > { %v483_v45 = vrot.slane %v482_v43, 2  ;;  %v497_v46 = vadd.f32 %v496_v44, %v495_v42 }
 0x176   : > { %v484_v47 = vadd.f32 %v483_v45, %v482_v43  ;;  %v498_v48 = vrot.slane %v497_v46, 2 }
 0x178   : > { %v485_v49 = vrot.slane %v484_v47, 1  ;;  %v499_v50 = vadd.f32 %v498_v48, %v497_v46 }
 0x17a   : > { %v486_v51 = vadd.f32 %v485_v49, %v484_v47  ;;  %v500_v52 = vrot.slane %v499_v50, 1 }
 0x17c   : > { %v488_v53 = vmul.f32 0.03125, %v486_v51  ;;  %v501_v54 = vadd.f32 %v500_v52, %v499_v50 }
 0x17e   : > { %v502_v55 = vmul.f32 0.03125, %v501_v54  ;;  %v503_v56 = vmul.f32 %v488_v53, %v488_v53 }
 0x180   : > { %v504_v57 = vsub.f32 %v502_v55, %v503_v56 }
 0x182   : > { %v505_v58 = vmax.f32 %v504_v57, 0.0 }
 0x184   : > { %v506_v59 = vadd.f32 1e-05, %v505_v58 }
 0x186   : > { %887 = vrsqrt.f32 %v506_v59 }
 0x190   : > { %v888_v0 = vpop.eup %887 }
 0x191   : > { %v509_v1 = vmul.f32 %v888_v0, %v508_v62 }
 0x193   : > { %v511_v3 = vmul.f32 %v509_v1, %v488_v53  ;;  %v517_v4 = vrot.slane %v509_v1, %v516_v63 }
 0x195   : > { %v512_v5 = vsub.f32 %v510_v2, %v511_v3  ;;  %v519_v6 = vmul.f32 %v787_v24, %v517_v4  ;;  %v520_v7 = vmul.f32 %v790_v30, %v517_v4  ;;  %v521_v8 = vmul.f32 %v793_v26, %v517_v4 }
 0x196   : > { %v522_v9 = vmul.f32 %v796_v31, %v517_v4 }
 0x197   : > { %v527_v10 = vrot.slane %v512_v5, %v516_v63 }
 0x199   : > { %v529_v11 = vadd.f32 %v527_v10, %v519_v6  ;;  %v530_v12 = vadd.f32 %v527_v10, %v520_v7  ;;  %v531_v13 = vadd.f32 %v527_v10, %v521_v8  ;;  %v532_v14 = vadd.f32 %v527_v10, %v522_v9  ;;  %563 = sbr.rel (!%p1298_p12) target bundleno = 425 (0x1a9), region = 52 }
 0x19b   : > { %v533_v15 = vmax.f32 %v529_v11, 0.0  ;;  %v534_v16 = vmax.f32 %v530_v12, 0.0  ;;  %v535_v17 = vmax.f32 %v531_v13, 0.0  ;;  %v536_v18 = vmax.f32 %v532_v14, 0.0 }
 0x19d   : > { %v761_v19 = vpack.c.bf16 %v534_v16, %v533_v15  ;;  %v766_v20 = vpack.c.bf16 %v536_v18, %v535_v17 }
 0x19f   : > { %762 = vst [vmem:[%s275_s26] sm:$0xff] %v761_v19   ;;  %768 = vst [vmem:[%s275_s26 + $0x8] sm:$0xff] %v766_v20  }
 0x1a6   : > { %v581_v21 = vld [vmem:[%s275_s26] sm:$0xf]  ;;  %v583_v22 = vld [vmem:[%s275_s26 + $0x4] sm:$0xf]  ;;  %v585_v23 = vld [vmem:[%s275_s26 + $0x8] sm:$0xf] }
 0x1a7   : > { %v587_v24 = vld [vmem:[%s275_s26 + $0xc] sm:$0xf]  ;;  %582 = vst [vmem:[%s565_s1] sm:$0xf] %v581_v21  ;;  %584 = vst [vmem:[%s565_s1 + $0x8] sm:$0xf] %v583_v22 }
 0x1a8   : > { %586 = vst [vmem:[%s565_s1 + $0x10] sm:$0xf] %v585_v23  ;;  %588 = vst [vmem:[%s565_s1 + $0x18] sm:$0xf] %v587_v24 }
 0x1a9 PF: > { %p17_p2 = scmp.ge.s32.totalorder %s1072_s20, 4   ;;  %s1299_s15 = smov %s1009_s16 }
 0x1aa   : > { %s1300_s16 = smov %s1013_s17  ;;  %s1301_s17 = smov %s1082_s23 }
 0x1ab   : > { %s1302_s18 = smov %s1072_s20  ;;  %19 = sbr.rel (!%p17_p2) target bundleno = 7 (0x7), region = 141 }
 0x1b2   :  { %629 = vsyncpa [#allocation3], 1 }
 0x1b3   :  { %631 = vsyncpa [#allocation3 + $0x1], 1 }
 0x1b4   :  { %632 = vsyncpa [#allocation5], 1 }
 0x1b5   :  { %634 = vsyncpa [#allocation5 + $0x1], 1 }

// kernel: projection_mlp.3
= control target key start
LH: loop header
LB: loop body
LE: loop exit
PB: predicated region body
PF: predicated region fallthrough
CT: control target
= control target key end

     0   :  { %7 = vsyncpa [#allocation4], 0  ;;  %s1069_s0 = inlined_call_operand.vmem [shape: bf16[32,256], index: 0, kind: input, shape index: {}]   ;;  %s1070_s1 = inlined_call_operand.vmem [shape: bf16[256,256], index: 1, kind: input, shape index: {}]   ;;  %s1071_s2 = inlined_call_operand.hbm [shape: f32[32,256], index: 2, kind: output, shape index: {}]  }
   0x1   :  { %9 = vsyncpa [#allocation4 + $0x1], 0  ;;  %s859_s9 = smov 0   ;;  %s861_s10 = smov 0  }
   0x2   :  { %s863_s11 = smov 0   ;;  %s865_s12 = smov 0  }
   0x3 LB: > { %s633_s13 = sadd.s32 4294967295, %s838_s12   ;;  %s634_s14 = sadd.s32 4294967294, %s838_s12   ;;  %s838_s12 = sphi %s865_s12, %s1077_s12   ;;  %s834_s11 = sphi %s863_s11, %s1076_s11   ;;  %s830_s10 = sphi %s861_s10, %s1075_s10   ;;  %s826_s9 = sphi %s859_s9, %s1074_s9  }
   0x4   : > { %s882_s15 = sadd.s32 1, %s838_s12   ;;  %s43_s16 = sadd.s32 1, %s834_s11 }
   0x5   : > { %s40_s17 = ssub.s32 %s838_s12, %s882_s15  ;;  %p50_p0 = scmp.ne.s32.totalorder %s834_s11, %s830_s10 }
   0x6   : > { %p41_p1 = scmp.eq.s32.totalorder %s40_s17, 0  ;;  %p51_p2 = scmp.eq.s32.totalorder %s838_s12, 0 }
   0x7   : > { %p80_p3 = scmp.eq.s32.totalorder %s633_s13, 1  ;;  %p85_p4 = scmp.ne.s32.totalorder %s830_s10, %s826_s9 }
   0x8   : > { %s895_s18 = scalar_select %p41_p1, %s834_s11, %s43_s16  }
   0x9   : > { %p52_p5 = por %p51_p2, %p50_p0  ;;  %p897_p6 = por %p80_p3, %p50_p0 }
   0xa   : > { %p86_p7 = scmp.eq.s32.totalorder %s634_s14, 1  ;;  %p636_p9 = scmp.ge.s32.totalorder %s838_s12, 2 }
   0xc   : > { %p901_p8 = por %p86_p7, %p85_p4  ;;  %105 = sbr.rel (%p636_p9) target bundleno = 44 (0x2c), region = 20 }
  0x13   : > { %108 = sbr.rel (!%p52_p5) target bundleno = 44 (0x2c), region = 24  ;;  %s110_s21 = sand.u32 (%p52_p5), 1, %s834_s11  }
  0x14   : > { %s638_s22 = sshll.u32 (%p52_p5), %s838_s12, 2  ;;  %s637_s23 = sshll.u32 (%p52_p5), %s110_s21, 7 }
  0x15   : > { %s913_s26 = scalar_lea.vmem (%p52_p5), %s1070_s1, %s638_s22  ;;  %s917_s27 = scalar_lea.vmem (%p52_p5), [#allocation2], %s637_s23 }
  0x16   : > { %v130_v0 = vld [vmem:[%s913_s26] sm:$0xf] (%p52_p5)  ;;  %v132_v1 = vld [vmem:[%s913_s26 + $0x8] sm:$0xf] (%p52_p5)  ;;  %v134_v2 = vld [vmem:[%s913_s26 + $0x10] sm:$0xf] (%p52_p5) }
  0x17   : > { %131 = vst [vmem:[%s917_s27] sm:$0xf] (%p52_p5), %v130_v0  ;;  %133 = vst [vmem:[%s917_s27 + $0x4] sm:$0xf] (%p52_p5), %v132_v1  ;;  %v136_v3 = vld [vmem:[%s913_s26 + $0x18] sm:$0xf] (%p52_p5) }
  0x18   : > { %v138_v4 = vld [vmem:[%s913_s26 + $0x20] sm:$0xf] (%p52_p5)  ;;  %135 = vst [vmem:[%s917_s27 + $0x8] sm:$0xf] (%p52_p5), %v134_v2  ;;  %137 = vst [vmem:[%s917_s27 + $0xc] sm:$0xf] (%p52_p5), %v136_v3 }
  0x19   : > { %139 = vst [vmem:[%s917_s27 + $0x10] sm:$0xf] (%p52_p5), %v138_v4  ;;  %v140_v5 = vld [vmem:[%s913_s26 + $0x28] sm:$0xf] (%p52_p5)  ;;  %v142_v6 = vld [vmem:[%s913_s26 + $0x30] sm:$0xf] (%p52_p5) }
  0x1a   : > { %v144_v7 = vld [vmem:[%s913_s26 + $0x38] sm:$0xf]  ;;  %141 = vst [vmem:[%s917_s27 + $0x14] sm:$0xf] %v140_v5  ;;  %143 = vst [vmem:[%s917_s27 + $0x18] sm:$0xf] %v142_v6 }
  0x1b   : > { %145 = vst [vmem:[%s917_s27 + $0x1c] sm:$0xf] %v144_v7  ;;  %v146_v8 = vld [vmem:[%s913_s26 + $0x40] sm:$0xf]  ;;  %v148_v9 = vld [vmem:[%s913_s26 + $0x48] sm:$0xf] }
  0x1c   : > { %v150_v10 = vld [vmem:[%s913_s26 + $0x50] sm:$0xf]  ;;  %147 = vst [vmem:[%s917_s27 + $0x20] sm:$0xf] %v146_v8  ;;  %149 = vst [vmem:[%s917_s27 + $0x24] sm:$0xf] %v148_v9 }
  0x1d   : > { %151 = vst [vmem:[%s917_s27 + $0x28] sm:$0xf] %v150_v10  ;;  %v152_v11 = vld [vmem:[%s913_s26 + $0x58] sm:$0xf]  ;;  %v154_v12 = vld [vmem:[%s913_s26 + $0x60] sm:$0xf] }
  0x1e   : > { %v156_v13 = vld [vmem:[%s913_s26 + $0x68] sm:$0xf]  ;;  %153 = vst [vmem:[%s917_s27 + $0x2c] sm:$0xf] %v152_v11  ;;  %155 = vst [vmem:[%s917_s27 + $0x30] sm:$0xf] %v154_v12 }
  0x1f   : > { %157 = vst [vmem:[%s917_s27 + $0x34] sm:$0xf] %v156_v13  ;;  %v158_v14 = vld [vmem:[%s913_s26 + $0x70] sm:$0xf]  ;;  %v160_v15 = vld [vmem:[%s913_s26 + $0x78] sm:$0xf] }
  0x20   : > { %v162_v16 = vld [vmem:[%s913_s26 + $0x80] sm:$0xf]  ;;  %159 = vst [vmem:[%s917_s27 + $0x38] sm:$0xf] %v158_v14  ;;  %161 = vst [vmem:[%s917_s27 + $0x3c] sm:$0xf] %v160_v15 }
  0x21   : > { %163 = vst [vmem:[%s917_s27 + $0x40] sm:$0xf] %v162_v16  ;;  %v164_v17 = vld [vmem:[%s913_s26 + $0x88] sm:$0xf]  ;;  %v166_v18 = vld [vmem:[%s913_s26 + $0x90] sm:$0xf] }
  0x22   : > { %v168_v19 = vld [vmem:[%s913_s26 + $0x98] sm:$0xf]  ;;  %165 = vst [vmem:[%s917_s27 + $0x44] sm:$0xf] %v164_v17  ;;  %167 = vst [vmem:[%s917_s27 + $0x48] sm:$0xf] %v166_v18 }
  0x23   : > { %169 = vst [vmem:[%s917_s27 + $0x4c] sm:$0xf] %v168_v19  ;;  %v170_v20 = vld [vmem:[%s913_s26 + $0xa0] sm:$0xf]  ;;  %v172_v21 = vld [vmem:[%s913_s26 + $0xa8] sm:$0xf] }
  0x24   : > { %v174_v22 = vld [vmem:[%s913_s26 + $0xb0] sm:$0xf]  ;;  %171 = vst [vmem:[%s917_s27 + $0x50] sm:$0xf] %v170_v20  ;;  %173 = vst [vmem:[%s917_s27 + $0x54] sm:$0xf] %v172_v21 }
  0x25   : > { %175 = vst [vmem:[%s917_s27 + $0x58] sm:$0xf] %v174_v22  ;;  %v176_v23 = vld [vmem:[%s913_s26 + $0xb8] sm:$0xf]  ;;  %v178_v24 = vld [vmem:[%s913_s26 + $0xc0] sm:$0xf] }
  0x26   : > { %v180_v25 = vld [vmem:[%s913_s26 + $0xc8] sm:$0xf]  ;;  %177 = vst [vmem:[%s917_s27 + $0x5c] sm:$0xf] %v176_v23  ;;  %179 = vst [vmem:[%s917_s27 + $0x60] sm:$0xf] %v178_v24 }
  0x27   : > { %181 = vst [vmem:[%s917_s27 + $0x64] sm:$0xf] %v180_v25  ;;  %v182_v26 = vld [vmem:[%s913_s26 + $0xd0] sm:$0xf]  ;;  %v184_v27 = vld [vmem:[%s913_s26 + $0xd8] sm:$0xf] }
  0x28   : > { %v186_v28 = vld [vmem:[%s913_s26 + $0xe0] sm:$0xf]  ;;  %183 = vst [vmem:[%s917_s27 + $0x68] sm:$0xf] %v182_v26  ;;  %185 = vst [vmem:[%s917_s27 + $0x6c] sm:$0xf] %v184_v27 }
  0x29   : > { %187 = vst [vmem:[%s917_s27 + $0x70] sm:$0xf] %v186_v28  ;;  %v188_v29 = vld [vmem:[%s913_s26 + $0xe8] sm:$0xf]  ;;  %v190_v30 = vld [vmem:[%s913_s26 + $0xf0] sm:$0xf] }
  0x2a   : > { %v192_v31 = vld [vmem:[%s913_s26 + $0xf8] sm:$0xf]  ;;  %189 = vst [vmem:[%s917_s27 + $0x74] sm:$0xf] %v188_v29  ;;  %191 = vst [vmem:[%s917_s27 + $0x78] sm:$0xf] %v190_v30 }
  0x2b   : > { %193 = vst [vmem:[%s917_s27 + $0x7c] sm:$0xf] %v192_v31 }
  0x2c PF: > { %p639_p10 = scmp.ge.s32.totalorder %s838_s12, 1  ;;  %p279_p11 = scmp.lt.s32.totalorder %s838_s12, 3 }
  0x2e   : > { %p280_p12 = pnand %p639_p10, %p279_p11 }
  0x2f   : > { %s984_s28 = sand.u32 (!%p280_p12), 1, %s830_s10   ;;  %v770_v32 = vld [vmem:[%s1069_s0 + $0x4] ss:$8 sps:$4 sm:$0xff] (!%p280_p12)   ;;  %v773_v33 = vld [vmem:[%s1069_s0 + $0x14] ss:$8 sps:$4 sm:$0xff] (!%p280_p12)   ;;  %s663_s23 = sshll.u32 (!%p280_p12), %s633_s13, 7 }
  0x30   : > { %283 = sbr.rel (%p280_p12) target bundleno = 362 (0x16a), region = 65  ;;  %s640_s29 = sshll.u32 (!%p280_p12), %s984_s28, 7  ;;  %492 = vmatprep.mubr.bf16.mxu0 (!%p280_p12), %v770_v32  ;;  %500 = vmatprep.mubr.bf16.mxu1 (!%p280_p12), %v773_v33  ;;  %v768_v50 = vld [vmem:[%s1069_s0] ss:$8 sps:$4 sm:$0xff] (!%p280_p12)   ;;  %v771_v51 = vld [vmem:[%s1069_s0 + $0x10] ss:$8 sps:$4 sm:$0xff] (!%p280_p12)  }
  0x31   : > { %s993_s6 = scalar_lea.vmem (!%p280_p12), [#allocation2], %s640_s29  ;;  %s641_s17 = sshll.u32 (!%p280_p12), %s984_s28, 5 }
  0x32   : > { %v752_v34 = vld [vmem:[%s993_s6 + $0x40] sm:$0xff] (!%p280_p12)   ;;  %v754_v36 = vld [vmem:[%s993_s6 + $0x48] sm:$0xff] (!%p280_p12)   ;;  %v756_v38 = vld [vmem:[%s993_s6 + $0x50] sm:$0xff] (!%p280_p12)   ;;  %s306_s21 = scalar_lea.vmem (!%p280_p12), [#allocation3], %s641_s17  ;;  %s1025_s26 = scalar_lea.hbm (!%p280_p12), %s1071_s2, %s663_s23 }
  0x33   : > { %v753_v35 = vld [vmem:[%s993_s6] sm:$0xff] (!%p280_p12)   ;;  %666 = vmatprep.subr.bf16.mxu0 (!%p280_p12), %v752_v34  ;;  %694 = vmatprep.subr.bf16.mxu1 (!%p280_p12), %v752_v34  ;;  %v755_v37 = vld [vmem:[%s993_s6 + $0x8] sm:$0xff] (!%p280_p12)   ;;  %v757_v39 = vld [vmem:[%s993_s6 + $0x10] sm:$0xff] (!%p280_p12)   ;;  %s566_s22 = sshll.u32 (!%p280_p12), %s306_s21, 4  ;;  %s554_s13 = scalar_lea.sflag (!%p280_p12), [#allocation4], %s984_s28  ;;  %s1020_s22 = int_to_ptr.vmem [resolvable:$true] %s566_s22 }
  0x34   : > { %667 = vmatpush3.bf16.msra.mxu0 (!%p280_p12), %v753_v35  ;;  %702 = vmatpush3.bf16.msra.mxu1 (!%p280_p12), %v753_v35  ;;  %v758_v40 = vld [vmem:[%s993_s6 + $0x58] sm:$0xff] (!%p280_p12)   ;;  %v760_v42 = vld [vmem:[%s993_s6 + $0x60] sm:$0xff] (!%p280_p12)   ;;  %v762_v44 = vld [vmem:[%s993_s6 + $0x68] sm:$0xff] (!%p280_p12)   ;;  %s776_s27 = scalar_lea.vmem (!%p280_p12), %s1020_s22, 512  ;;  %s840_s29 = smov (!%p280_p12), [#allocation3]  }
  0x35   : > { %668 = vmatprep.subr.bf16.mxu0 (!%p280_p12), %v754_v36  ;;  %695 = vmatprep.subr.bf16.mxu1 (!%p280_p12), %v754_v36  ;;  %v759_v41 = vld [vmem:[%s993_s6 + $0x18] sm:$0xff] (!%p280_p12)   ;;  %v761_v43 = vld [vmem:[%s993_s6 + $0x20] sm:$0xff] (!%p280_p12)   ;;  %v763_v45 = vld [vmem:[%s993_s6 + $0x28] sm:$0xff] (!%p280_p12)   ;;  %p777_p13 = scmp.ne.s32.totalorder (!%p280_p12), %s1020_s22, %s776_s27  ;;  %s780_s30 = sshll.u32 (!%p280_p12), %s840_s29, 4  ;;  %s781_s30 = int_to_ptr.vmem [resolvable:$false] %s780_s30 }
  0x36   : > { %v764_v46 = vld [vmem:[%s993_s6 + $0x70] sm:$0xff] (!%p280_p12)   ;;  %v766_v48 = vld [vmem:[%s993_s6 + $0x78] sm:$0xff] (!%p280_p12)   ;;  %s782_s3 = scalar_lea.vmem (!%p280_p12), %s781_s30, 1024  ;;  %p783_p2 = scmp.lt.s32.totalorder (!%p280_p12), %s1020_s22, %s781_s30 }
  0x37   : > { %v765_v47 = vld [vmem:[%s993_s6 + $0x30] sm:$0xff]   ;;  %v767_v49 = vld [vmem:[%s993_s6 + $0x38] sm:$0xff]   ;;  %p778_p0 = pnand %p777_p13, %p897_p6  ;;  %p784_p3 = scmp.lt.s32.totalorder %s782_s3, %s776_s27 }
  0x38   : > { %669 = vmatpush3.bf16.msra.mxu0 %v755_v37  ;;  %703 = vmatpush3.bf16.msra.mxu1 %v755_v37 }
  0x39   : > { %670 = vmatprep.subr.bf16.mxu0 %v756_v38  ;;  %696 = vmatprep.subr.bf16.mxu1 %v756_v38  ;;  %p779_p1 = pneg %p778_p0  ;;  %p785_p4 = por %p784_p3, %p783_p2 }
  0x3b   : > { %p786_p5 = pnand %p785_p4, %p779_p1 }
  0x3c   : > { %671 = vmatpush3.bf16.msra.mxu0 %v757_v39  ;;  %704 = vmatpush3.bf16.msra.mxu1 %v757_v39 }
  0x3d   : > { %672 = vmatprep.subr.bf16.mxu0 %v758_v40  ;;  %697 = vmatprep.subr.bf16.mxu1 %v758_v40 }
  0x40   : > { %673 = vmatpush3.bf16.msra.mxu0 %v759_v41  ;;  %705 = vmatpush3.bf16.msra.mxu1 %v759_v41 }
  0x41   : > { %674 = vmatprep.subr.bf16.mxu0 %v760_v42  ;;  %698 = vmatprep.subr.bf16.mxu1 %v760_v42 }
  0x44   : > { %675 = vmatpush3.bf16.msra.mxu0 %v761_v43  ;;  %706 = vmatpush3.bf16.msra.mxu1 %v761_v43 }
  0x45   : > { %676 = vmatprep.subr.bf16.mxu0 %v762_v44  ;;  %699 = vmatprep.subr.bf16.mxu1 %v762_v44 }
  0x48   : > { %677 = vmatpush3.bf16.msra.mxu0 %v763_v45  ;;  %707 = vmatpush3.bf16.msra.mxu1 %v763_v45 }
  0x49   : > { %678 = vmatprep.subr.bf16.mxu0 %v764_v46  ;;  %700 = vmatprep.subr.bf16.mxu1 %v764_v46 }
  0x4c   : > { %679 = vmatpush3.bf16.msra.mxu0 %v765_v47  ;;  %708 = vmatpush3.bf16.msra.mxu1 %v765_v47 }
  0x4d   : > { %680 = vmatprep.subr.bf16.mxu0 %v766_v48  ;;  %701 = vmatprep.subr.bf16.mxu1 %v766_v48 }
  0x50   : > { %681 = vmatpush3.bf16.msra.mxu0 %v767_v49  ;;  %709 = vmatpush3.bf16.msra.mxu1 %v767_v49 }
  0x53   : > { %493 = vmatmul.mubr.bf16.vlgmr.msra.gmra.mrb[0].mxu0 %v768_v50  ;;  %501 = vmatmul.mubr.bf16.vlgmr.msra.gmra.mrb[0].mxu1 %v771_v51 }
 0x126   : > { %v682_v52 = vpop.f32.mrb[0].mxu0  ;;  %v688_v53 = vpop.f32.mrb[0].mxu1 }
 0x127   : > { %v683_v54 = vpop.f32.mrb[1].mxu0  ;;  %v689_v55 = vpop.f32.mrb[1].mxu1 }
 0x128   : > { %v684_v56 = vadd.f32 %v683_v54, %v682_v52  ;;  %v685_v57 = vpop.f32.mrb[2].mxu0  ;;  %v690_v58 = vadd.f32 %v689_v55, %v688_v53  ;;  %v691_v59 = vpop.f32.mrb[2].mxu1 }
 0x129   : > { %v686_v60 = vpop.f32.mrb[3].mxu0  ;;  %v692_v61 = vpop.f32.mrb[3].mxu1 }
 0x12a   : > { %v687_v62 = vadd.f32 %v686_v60, %v685_v57  ;;  %v693_v63 = vadd.f32 %v692_v61, %v691_v59  ;;  %v520_v0 = vmul.f32 %v684_v56, %v684_v56  ;;  %v522_v1 = vmul.f32 %v690_v58, %v690_v58 }
 0x12c   : > { %v509_v2 = vadd.f32 %v687_v62, %v684_v56  ;;  %v521_v3 = vmul.f32 %v687_v62, %v687_v62  ;;  %v523_v7 = vmul.f32 %v693_v63, %v693_v63 }
 0x12e   : > { %v524_v4 = vadd.f32 %v521_v3, %v520_v0  ;;  %v510_v5 = vadd.f32 %v690_v58, %v509_v2 }
 0x130   : > { %v511_v6 = vadd.f32 %v693_v63, %v510_v5  ;;  %v525_v8 = vadd.f32 %v524_v4, %v522_v1 }
 0x132   : > { %v512_v9 = vrot.slane %v511_v6, 4  ;;  %v526_v10 = vadd.f32 %v525_v8, %v523_v7 }
 0x134   : > { %v513_v11 = vadd.f32 %v512_v9, %v511_v6  ;;  %v527_v12 = vrot.slane %v526_v10, 4 }
 0x136   : > { %v514_v13 = vrot.slane %v513_v11, 2  ;;  %v528_v14 = vadd.f32 %v527_v12, %v526_v10 }
 0x138   : > { %v515_v15 = vadd.f32 %v514_v13, %v513_v11  ;;  %v529_v16 = vrot.slane %v528_v14, 2 }
 0x13a   : > { %v516_v17 = vrot.slane %v515_v15, 1  ;;  %v530_v18 = vadd.f32 %v529_v16, %v528_v14 }
 0x13c   : > { %v517_v19 = vadd.f32 %v516_v17, %v515_v15  ;;  %v531_v20 = vrot.slane %v530_v18, 1 }
 0x13e   : > { %v519_v21 = vmul.f32 0.03125, %v517_v19  ;;  %v532_v22 = vadd.f32 %v531_v20, %v530_v18 }
 0x140   : > { %v533_v23 = vmul.f32 0.03125, %v532_v22  ;;  %v534_v24 = vmul.f32 %v519_v21, %v519_v21 }
 0x142   : > { %v535_v25 = vsub.f32 %v533_v23, %v534_v24 }
 0x144   : > { %v536_v26 = vmax.f32 %v535_v25, 0.0 }
 0x146   : > { %v537_v27 = vadd.f32 1e-05, %v536_v26 }
 0x148   : > { %774 = vrsqrt.f32 %v537_v27 }
 0x152   : > { %v775_v28 = vpop.eup %774 }
 0x153   : > { %v539_v29 = vmul.f32 %v775_v28, %v519_v21  ;;  %v541_v30 = vmul.f32 %v775_v28, %v684_v56  ;;  %v542_v31 = vmul.f32 %v775_v28, %v687_v62  ;;  %v543_v32 = vmul.f32 %v775_v28, %v690_v58 }
 0x154   : > { %v544_v33 = vmul.f32 %v775_v28, %v693_v63 }
 0x155   : > { %v540_v34 = vsub.f32 0.0, %v539_v29 }
 0x157   : > { %v545_v35 = vadd.f32 %v541_v30, %v540_v34  ;;  %v546_v36 = vadd.f32 %v542_v31, %v540_v34  ;;  %v547_v37 = vadd.f32 %v543_v32, %v540_v34  ;;  %v548_v38 = vadd.f32 %v544_v33, %v540_v34 }
 0x159   : > { %549 = vst [vmem:[%s306_s21] sm:$0xff] %v545_v35  ;;  %550 = vst [vmem:[%s306_s21 + $0x8] sm:$0xff] %v546_v36 }
 0x15a   : > { %551 = vst [vmem:[%s306_s21 + $0x10] sm:$0xff] %v547_v37  ;;  %552 = vst [vmem:[%s306_s21 + $0x18] sm:$0xff] %v548_v38 }
 0x15b   : > { %789 = shalt.err (!%p786_p5)
}
 0x15c   : > { %s790_s4 = scalar_lea.hbm %s1025_s26, 512  ;;  %s794_s7 = scalar_lea.hbm %s1071_s2, 1024 }
 0x15d   : > { %p791_p7 = scmp.ne.s32.totalorder %s1025_s26, %s790_s4  ;;  %p795_p12 = scmp.lt.u32.totalorder %s1025_s26, %s1071_s2 }
 0x15e   : > { %p796_p13 = scmp.lt.u32.totalorder %s794_s7, %s790_s4  ;;  %p798_p1 = scmp.lt.u32.totalorder %s790_s4, %s1025_s26 }
 0x15f   : > { %p792_p10 = pnand %p791_p7, %p897_p6 }
 0x160   : > { %p797_p0 = por %p796_p13, %p795_p12 }
 0x161   : > { %p793_p11 = pneg %p792_p10 }
 0x162   : > { %p799_p2 = por %p798_p1, %p797_p0 }
 0x164   : > { %p800_p3 = pnand %p799_p2, %p793_p11 }
 0x166   : > { %803 = shalt.err (!%p800_p3)
}
 0x167   : > { %s841_s16 = smov 128   ;;  %s842_s17 = smov 256  }
 0x168   : > { %s843_s21 = smov 8  }
 0x169   : > { %710 = dma.vmem_to_hbm [thread:$0]  (%p897_p6), %s1020_s22, 512, %s1025_s26, %s554_s13, %s841_s16, %s842_s17, %s843_s21  }
 0x16a PF: > { %s581_s23 = sand.u32 1, %s826_s9   ;;  %p713_p4 = pnand %p636_p9, %p901_p8 }
 0x16b   : > { %s582_s24 = scalar_lea.sflag [#allocation4], %s581_s23 }
 0x16c   : > { %821 = dma.done.wait (!%p713_p4), %s582_s24, 512  }
 0x16d   : > { %823 = vsyncadd (!%p713_p4), %s582_s24, 4294966784  ;;  %p12_p5 = scmp.ge.s32.totalorder %s882_s15, 4   ;;  %s1074_s9 = smov %s830_s10 }
 0x16e   : > { %s1075_s10 = smov %s834_s11  ;;  %s1076_s11 = smov %s895_s18 }
 0x16f   : > { %s1077_s12 = smov %s882_s15  ;;  %14 = sbr.rel (!%p12_p5) target bundleno = 3 (0x3), region = 109 }
 0x176   :  { %587 = vsyncpa [#allocation4], 1 }
 0x177   :  { %589 = vsyncpa [#allocation4 + $0x1], 1 }

</bundles_post_ra>
